<compile_context>
chip_gen: v7x
topology: tpu7x:2x2x1
jax: 0.10.0
libtpu: 0.0.40
codegen_flags: <defaults>
</compile_context>

<pallas_src>
import jax
import jax.numpy as jnp
from jax.experimental import pallas as pl
from jax.experimental.pallas import tpu as pltpu


def _pos_embed_kernel(w_ref, out_ref):
    # w_ref:   (1, chunk)           -- slice of flattened W_pos[:seq]
    # out_ref: (batch_tile, chunk)  -- same data replicated over batch rows
    out_ref[...] = jnp.broadcast_to(w_ref[...], out_ref.shape)


def _largest_aligned_divisor(n, align, limit):
    """Largest d with d % align == 0, n % d == 0, d <= limit (None if none)."""
    best = None
    d = align
    hi = min(n, limit)
    while d <= hi:
        if n % d == 0:
            best = d
        d += align
    return best


def _pick_chunk(flat, max_elems):
    """Lane-axis chunk: full seq*d_model if small, else a 128-multiple divisor."""
    if flat <= max_elems:
        return flat
    d = _largest_aligned_divisor(flat, 128, max_elems)
    return d if d is not None else flat  # fallback: full extent (always legal)


def _pick_batch_tile(batch, limit):
    """Batch tile: full batch if it fits, else a multiple-of-8 divisor."""
    if batch <= limit:
        return batch
    d = _largest_aligned_divisor(batch, 8, limit)
    return d if d is not None else batch  # fallback: full batch (always legal)


def pos_embed(tokens: jax.Array, w_pos: jax.Array,
              *, target_block_bytes: int = 4 * 1024 * 1024) -> jax.Array:
    """Equivalent of PosEmbed.forward: repeat W_pos[:seq] over the batch dim.

    tokens: [batch, seq] (int) -- values unused, only shape.
    w_pos : [n_ctx, d_model]
    returns: [batch, seq, d_model] (same dtype as w_pos)
    """
    batch, seq = tokens.shape
    n_ctx, d_model = w_pos.shape
    assert seq <= n_ctx

    dtype = w_pos.dtype
    itemsize = jnp.dtype(dtype).itemsize
    flat = seq * d_model

    # --- static tile selection (python ints) ------------------------------
    # Smallest legal batch tile: second-to-last block dim must be a multiple
    # of 8 or equal the full batch.
    min_tb = 8 if (batch >= 8 and batch % 8 == 0) else batch
    # Chunk along the flattened lane axis such that a min_tb-row block stays
    # within the target block size (and is 128-dense if it tiles).
    chunk = _pick_chunk(flat, max(128, target_block_bytes // (min_tb * itemsize)))
    # Pack as many batch rows as fit in the target on top of that chunk.
    tb = _pick_batch_tile(batch, max(min_tb, target_block_bytes // (chunk * itemsize)))

    num_chunks = flat // chunk
    num_btiles = batch // tb

    # Flattened views: trailing dim is seq*d_model -> lane-dense stores even
    # when d_model < 128.  Row-major reshape is a free bitcast.
    w_flat = w_pos[:seq].reshape(1, flat)

    out_flat = pl.pallas_call(
        _pos_embed_kernel,
        out_shape=jax.ShapeDtypeStruct((batch, flat), dtype),
        # Batch innermost: the constant W_pos chunk keeps the same block index
        # across the inner axis, so its re-fetch is skipped.
        grid=(num_chunks, num_btiles),
        in_specs=[
            pl.BlockSpec((1, chunk), lambda c, b: (0, c)),
        ],
        out_specs=pl.BlockSpec((tb, chunk), lambda c, b: (b, c)),
        compiler_params=pltpu.CompilerParams(
            # Every grid point writes a distinct output block -> fully
            # parallel; lets v7x shard the grid across its 2 TensorCores.
            dimension_semantics=("parallel", "parallel"),
            # ~4 MiB blocks * (2x out + 2x in) << 32 MiB on every generation
            # (v7x physical VMEM is 64 MiB).
            vmem_limit_bytes=32 * 1024 * 1024,
        ),
    )(w_flat)

    return out_flat.reshape(batch, seq, d_model)


if __name__ == "__main__":
    # Small config consistent with the module (Config scaled down).
    batch, seq = 2, 8
    n_ctx, d_model = 16, 32
    init_range = 0.02

    key = jax.random.PRNGKey(0)
    k_w, k_tok = jax.random.split(key)

    # Deterministic init: normal(std=init_range), like nn.init.normal_.
    w_pos = init_range * jax.random.normal(k_w, (n_ctx, d_model), dtype=jnp.float32)
    tokens = jax.random.randint(k_tok, (batch, seq), 0, n_ctx, dtype=jnp.int32)

    out = jax.block_until_ready(pos_embed(tokens, w_pos))
    ref = jnp.broadcast_to(w_pos[:seq][None, :, :], (batch, seq, d_model))
    assert out.shape == (batch, seq, d_model)
    assert out.dtype == w_pos.dtype
    assert jnp.array_equal(out, ref), "mismatch vs reference (small shape)"

    # A second shape that actually exercises the tiled path
    # (multi-block grid, batch packing into 4 MiB lane-dense blocks).
    batch2, seq2, d2, nctx2 = 32, 256, 512, 512
    k_w2, k_t2 = jax.random.split(k_w)
    w_pos2 = init_range * jax.random.normal(k_w2, (nctx2, d2), dtype=jnp.float32)
    tokens2 = jax.random.randint(k_t2, (batch2, seq2), 0, nctx2, dtype=jnp.int32)
    out2 = jax.block_until_ready(pos_embed(tokens2, w_pos2))
    ref2 = jnp.broadcast_to(w_pos2[:seq2][None, :, :], (batch2, seq2, d2))
    assert jnp.array_equal(out2, ref2), "mismatch vs reference (tiled shape)"

    print("KERNEL_OK")
</pallas_src>

<mosaic_0001>
module attributes {stable_mosaic.version = 11 : i64} {
  func.func @_pos_embed_kernel(%arg0: i32, %arg1: i32, %arg2: memref<1x256xf32, #tpu.memory_space<vmem>>, %arg3: memref<2x256xf32, #tpu.memory_space<vmem>>) attributes {dimension_semantics = [#tpu.dimension_semantics<parallel>, #tpu.dimension_semantics<parallel>], iteration_bounds = array<i64: 1, 1>, scalar_prefetch = 0 : i64, scratch_operands = 0 : i64, tpu.core_type = #tpu.core_type<tc>, window_params = [{transform_indices = @transform_0, window_bounds = array<i64: 1, 256>}, {transform_indices = @transform_1, window_bounds = array<i64: 2, 256>}]} {
    %c0 = arith.constant 0 : index
    %c0_0 = arith.constant 0 : index
    %0 = vector.load %arg2[%c0, %c0_0] : memref<1x256xf32, #tpu.memory_space<vmem>>, vector<1x256xf32>
    %1 = vector.shape_cast %0 : vector<1x256xf32> to vector<1x256xf32>
    %2 = vector.broadcast %1 : vector<1x256xf32> to vector<2x256xf32>
    %c0_1 = arith.constant 0 : index
    %c0_2 = arith.constant 0 : index
    %3 = vector.load %arg3[%c0_1, %c0_2] : memref<2x256xf32, #tpu.memory_space<vmem>>, vector<2x256xf32>
    tpu.vector_store %arg3[%c0_1, %c0_2], %2 {strides = array<i32>} : memref<2x256xf32, #tpu.memory_space<vmem>>, vector<2x256xf32>,
    return
  }
  func.func @transform_0(%arg0: i32, %arg1: i32) -> (i32, i32) {
    %c0_i32 = arith.constant 0 : i32
    %c0_i32_0 = arith.constant 0 : i32
    return %c0_i32, %arg0 : i32, i32
  }
  func.func @transform_1(%arg0: i32, %arg1: i32) -> (i32, i32) {
    %c0_i32 = arith.constant 0 : i32
    return %arg1, %arg0 : i32, i32
  }
}

</mosaic_0001>

<bundles_post_ra>
// kernel: tpu_custom_call.1
= control target key start
LH: loop header
LB: loop body
LE: loop exit
PB: predicated region body
PF: predicated region fallthrough
CT: control target
= control target key end

     0   :  { %6 = vsyncpa [#allocation3], 0  ;;  %s143_s0 = inlined_call_operand.hbm [shape: f32[1,256], index: 0, kind: input, shape index: {}]   ;;  %s144_s1 = inlined_call_operand.hbm [shape: f32[2,256], index: 1, kind: output, shape index: {}]  }
   0x1   :  { %7 = vsyncpa [#allocation4], 0  ;;  %s107_s6 = smov [#allocation2]   ;;  %s59_s10 = scalar_lea.hbm %s143_s0, 32 }
   0x2   :  { %s14_s7 = sshll.u32 %s107_s6, 4  ;;  %p60_p0 = scmp.ne.s32.totalorder %s143_s0, %s59_s10  ;;  %s15_s7 = int_to_ptr.vmem [resolvable:$true] %s14_s7 }
   0x3   :  { %p63_p1 = scmp.lt.u32.totalorder %s59_s10, %s143_s0 }
   0x5   :  { %p65_p2 = pnand %p63_p1, %p60_p0 }
   0x7   :  { %68 = shalt.err (!%p65_p2)
}
   0x8   :  { %s69_s15 = scalar_lea.vmem %s15_s7, 32  ;;  %p74_p4 = scmp.lt.s32.totalorder %s15_s7, %s15_s7 }
   0x9   :  { %p70_p3 = scmp.ne.s32.totalorder %s15_s7, %s69_s15  ;;  %p75_p5 = scmp.lt.s32.totalorder %s69_s15, %s69_s15 }
   0xb   :  { %p76_p6 = por %p75_p5, %p74_p4 }
   0xd   :  { %p77_p7 = pnand %p76_p6, %p70_p3 }
   0xf   :  { %80 = shalt.err (!%p77_p7)
}
  0x10   :  { %17 = dma.hbm_to_vmem [thread:$0]  %s143_s0, 32, %s15_s7, [#allocation3]  }
  0x11   :  { %103 = dma.done.wait [#allocation3], 32  }
  0x12   :  { %104 = vsyncadd [#allocation3], 4294967264  ;;  %v23_v0 = vlaneseq  ;;  %v21_v4 = vld [vmem:[#allocation2] sm:$0x3]  ;;  %s108_s18 = smov [#allocation5]  }
  0x13   :  { %s47_s19 = sshll.u32 %s108_s18, 4  ;;  %s48_s19 = int_to_ptr.vmem [resolvable:$true] %s47_s19 }
  0x14   :  { %v24_v1 = vshrl.u32 %v23_v0, 7  ;;  %s81_s20 = scalar_lea.vmem %s48_s19, 64  ;;  %p86_p9 = scmp.lt.s32.totalorder %s48_s19, %s48_s19 }
  0x15   :  { %p82_p8 = scmp.ne.s32.totalorder %s48_s19, %s81_s20  ;;  %p87_p10 = scmp.lt.s32.totalorder %s81_s20, %s81_s20 }
  0x16   :  { %v25_v2 = vsub.s32 0, %v24_v1  ;;  %v29_v3 = vsub.s32 1, %v24_v1 }
  0x17   :  { %p88_p11 = por %p87_p10, %p86_p9 }
  0x18   :  { %v26_v5 = vrot.slane %v21_v4, %v25_v2  ;;  %v30_v6 = vrot.slane %v21_v4, %v29_v3 }
  0x19   :  { %p89_p12 = pnand %p88_p11, %p82_p8 }
  0x1a   :  { %v31_v7 = vcombine.low %v26_v5, %v30_v6 }
  0x1c   :  { %56 = vst.sshfl [vmem:[#allocation5] sm:$0x33 pattern:$0x76325410] %v31_v7 }
  0x1d   :  { %92 = shalt.err (!%p89_p12)
}
  0x1e   :  { %s93_s22 = scalar_lea.hbm %s144_s1, 64 }
  0x1f   :  { %p94_p13 = scmp.ne.s32.totalorder %s144_s1, %s93_s22  ;;  %p97_p0 = scmp.lt.u32.totalorder %s93_s22, %s144_s1 }
  0x21   :  { %p99_p1 = pnand %p97_p0, %p94_p13 }
  0x23   :  { %102 = shalt.err (!%p99_p1)
}
  0x24   :  { %50 = dma.vmem_to_hbm [thread:$0]  %s48_s19, 64, %s144_s1, [#allocation4]  }
  0x25   :  { %105 = dma.done.wait [#allocation4], 64  }
  0x26   :  { %106 = vsyncadd [#allocation4], 4294967232 }
  0x27   :  { %54 = vsyncpa [#allocation3], 1 }
  0x28   :  { %55 = vsyncpa [#allocation4], 1 }

</bundles_post_ra>
